<compile_context>
chip_gen: v6e
topology: v6e:2x2x1
jax: 0.10.0
libtpu: 0.0.40
codegen_flags: <defaults>
</compile_context>

<pallas_src>
import jax
import jax.numpy as jnp
from jax.experimental import pallas as pl
from jax.experimental.pallas import tpu as pltpu

# Constants held by the two submodules (Submodule(1), Submodule(2)).
S1_N = 1
S2_N = 2

# Pre-staged device constants for the trace-time (host bool) fast path.
_ONE = jnp.asarray([S1_N], dtype=jnp.int32)
_TWO = jnp.asarray([S2_N], dtype=jnp.int32)


# ---------------------------------------------------------------------------
# Pallas kernel: scalar-only SMEM select, branchless (scalar-ALU only).
# ---------------------------------------------------------------------------
def _select_kernel(b_ref, out_ref):
    # b_ref:   SMEM ref, shape (1,), int32 (nonzero == True)
    # out_ref: SMEM ref, shape (1,), int32
    # 1 if b else 2  ==  2 - (b != 0)
    out_ref[0] = jnp.int32(S2_N) - (b_ref[0] != 0).astype(jnp.int32)


@jax.jit
def _forward_pallas(b_i32):
    """Pallas path. `b_i32` MUST already be an int32 array of shape (1,).

    Requiring int32 at the boundary means the jitted program issues exactly
    one device op (the Mosaic custom call) — no convert/reshape HLO.
    """
    return pl.pallas_call(
        _select_kernel,
        out_shape=jax.ShapeDtypeStruct((1,), jnp.int32),
        in_specs=[pl.BlockSpec(memory_space=pltpu.SMEM)],
        out_specs=pl.BlockSpec(memory_space=pltpu.SMEM),
    )(b_i32)


# ---------------------------------------------------------------------------
# Default device path: fused scalar XLA select (no custom-call dispatch).
# ---------------------------------------------------------------------------
@jax.jit
def _forward_device(b):
    """b is a traced / on-device scalar (bool or int). Single tiny fused HLO."""
    return (jnp.int32(S2_N) - jnp.asarray(b, dtype=jnp.int32)).reshape((1,))


def test_module_forward(b, use_pallas=False):
    """Equivalent of TestModule().forward(b): 1 if b else 2.

    Returns a (1,)-shaped int32 device array.  Indexing [0] on the result
    forces a device->host sync; avoid it on hot paths.
    """
    if not isinstance(b, (jax.Array, jax.core.Tracer)):
        # Host scalar (bool / int / numpy scalar): resolved at trace time,
        # returns a cached pre-staged device constant (zero runtime cost).
        return _ONE if bool(b) else _TWO
    if use_pallas:
        b_i32 = jnp.reshape(jnp.asarray(b, dtype=jnp.int32), (1,))
        return _forward_pallas(b_i32)
    return _forward_device(b)


if __name__ == "__main__":
    # Deterministic "input" construction — the only input is a boolean flag.
    key = jax.random.PRNGKey(0)
    b_rand_dev = jax.random.bernoulli(key, 0.5)   # device bool scalar

    # --- Run the Pallas kernel once on the device flag and block on it. ---
    b_rand_i32 = jnp.reshape(b_rand_dev.astype(jnp.int32), (1,))
    r_pallas = jax.block_until_ready(_forward_pallas(b_rand_i32))
    assert int(r_pallas[0]) == (S1_N if bool(b_rand_dev) else S2_N)

    # Verify both branches through the Pallas kernel path.
    r_true_p = jax.block_until_ready(
        test_module_forward(jnp.asarray(True), use_pallas=True))
    r_false_p = jax.block_until_ready(
        test_module_forward(jnp.asarray(False), use_pallas=True))
    assert int(r_true_p[0]) == S1_N, f"expected 1 for b=True, got {int(r_true_p[0])}"
    assert int(r_false_p[0]) == S2_N, f"expected 2 for b=False, got {int(r_false_p[0])}"

    # Verify both branches through the default fused-XLA device path.
    r_true_d = jax.block_until_ready(test_module_forward(jnp.asarray(True)))
    r_false_d = jax.block_until_ready(test_module_forward(jnp.asarray(False)))
    assert int(r_true_d[0]) == S1_N
    assert int(r_false_d[0]) == S2_N

    # Verify the trace-time (host bool) fast path returns cached constants.
    assert test_module_forward(True) is _ONE
    assert test_module_forward(False) is _TWO
    assert int(test_module_forward(True)[0]) == S1_N
    assert int(test_module_forward(False)[0]) == S2_N

    print("KERNEL_OK")
</pallas_src>

<mosaic_0001>
module attributes {stable_mosaic.version = 11 : i64} {
  func.func @_select_kernel(%arg0: memref<1xi32, #tpu.memory_space<smem>>, %arg1: memref<1xi32, #tpu.memory_space<smem>>) attributes {dimension_semantics = [], scalar_prefetch = 0 : i64, scratch_operands = 0 : i64, tpu.core_type = #tpu.core_type<tc>} {
    %c0 = arith.constant 0 : index
    %0 = memref.load %arg0[%c0] : memref<1xi32, #tpu.memory_space<smem>>
    %c0_i32 = arith.constant 0 : i32
    %1 = arith.cmpi ne, %0, %c0_i32 : i32
    %2 = arith.extui %1 : i1 to i32
    %c2_i32 = arith.constant 2 : i32
    %3 = arith.subi %c2_i32, %2 : i32
    %c0_0 = arith.constant 0 : index
    %4 = memref.load %arg1[%c0_0] : memref<1xi32, #tpu.memory_space<smem>>
    memref.store %3, %arg1[%c0_0] : memref<1xi32, #tpu.memory_space<smem>>
    return
  }
}

</mosaic_0001>

<bundles_post_ra>
// kernel: _forward_pallas.1
= control target key start
LH: loop header
LB: loop body
LE: loop exit
PB: predicated region body
PF: predicated region fallthrough
CT: control target
= control target key end

     0   :  { %7 = vsyncpa [#allocation4], 0  ;;  %s40_s10 = smov [#allocation3]   ;;  %s57_s0 = inlined_call_operand.<no memory space> [shape: s32[1], index: 0, kind: input, shape index: {}]   ;;  %s58_s1 = inlined_call_operand.hbm [shape: s32[1], index: 1, kind: output, shape index: {}]  }
   0x1   :  { %p11_p0 = scmp.ne.s32.totalorder %s57_s0, 0 }
   0x3   :  { %s12_s8 = scalar_select %p11_p0, 1, 0 }
   0x5   :  { %s13_s9 = ssub.s32 2, %s12_s8 }
   0x6   :  { %15 = sst [smem:[#allocation3]] %s13_s9 }
   0x7   :  { %23 = dma.smem_to_hbm %s40_s10, 16, %s58_s1, [#allocation4]  }
   0x8   :  { %38 = dma.done.wait [#allocation4], 16  }
   0x9   :  { %39 = vsyncadd [#allocation4], 4294967280 }
   0xa   :  { %27 = sfence }
   0xb   :  { %28 = vsyncpa [#allocation4], 1 }

</bundles_post_ra>
